<compile_context>
chip_gen: v6e
topology: v6e:2x2x1
jax: 0.10.0
libtpu: 0.0.40
codegen_flags: <defaults>
</compile_context>

<pallas_src>
import jax
import jax.numpy as jnp
from jax.experimental import pallas as pl
from jax.experimental.pallas import tpu as pltpu


def _round_up(x, m):
    return (x + m - 1) // m * m


def _vmem_budget_bytes():
    """Per-core VMEM budget with headroom, derived from the running chip."""
    phys = 64 * 1024 * 1024  # conservative fallback (v7x per-TC physical VMEM)
    try:
        info = pltpu.get_tpu_info()
        for attr in ("vmem_capacity_bytes", "vmem_bytes", "vmem_size_bytes"):
            val = getattr(info, attr, None)
            if val:
                phys = int(val)
                break
    except Exception:
        pass
    # Leave ~12.5% for compiler-internal scratch / semaphores / metadata.
    return (phys * 7) // 8


def _candidate_ths(H):
    """Divisors of H that are multiples of 128, plus H itself, descending."""
    cands = {H}
    th = 128
    while th < H:
        if H % th == 0:
            cands.add(th)
        th += 128
    return sorted(cands, reverse=True)


def _choose_tiles(M, C_pad, H, x_bytes, out_bytes, cd_bytes, budget, tm):
    """Pick (TM, TH): the largest 128-friendly tiles fitting the VMEM budget."""
    ths = _candidate_ths(H)

    def fits(TM, TH):
        fixed = (2 * TM * C_pad * x_bytes        # x tiles (double-buffered)
                 + 2 * TM * C_pad * out_bytes    # out tiles (double-buffered)
                 + TM * C_pad * 4                # f32 accumulator scratch
                 + 2 * C_pad * 4)                # b2
        per_chunk = (2 * 2 * C_pad * TH * cd_bytes  # w1 + w2 chunks (x2 bufs)
                     + 2 * TH * 4                   # b1 chunk
                     + TM * TH * 4)                 # f32 hidden slab
        return fixed + per_chunk <= budget

    TM = min(tm, _round_up(M, 8))
    # Ensure >= 2 row tiles so the "parallel" axis can shard across v7x's two
    # TensorCores (no-op for large M where grid_m is already big).
    if M >= 16 and pl.cdiv(M, TM) < 2:
        TM = _round_up(pl.cdiv(M, 2), 8)

    while True:
        for TH in ths:
            if fits(TM, TH):
                return TM, TH
        if TM <= 128:
            return TM, ths[-1]          # best effort: smallest H chunk
        TM = max(128, _round_up(TM // 2, 128))


def _block_spec(shape, index_map, buffer_count=None):
    """BlockSpec with an optional explicit pipeline buffer count (guarded)."""
    if buffer_count is not None and hasattr(pl, "Buffered"):
        try:
            return pl.BlockSpec(shape, index_map,
                                pipeline_mode=pl.Buffered(buffer_count))
        except TypeError:
            pass
    return pl.BlockSpec(shape, index_map)


def _ffwd_kernel(x_ref, w1_ref, b1_ref, w2_ref, b2_ref, o_ref, acc_ref):
    # x_ref : (TM, C)  input dtype    w1_ref: (C, TH) bf16    b1_ref: (1, TH) f32
    # w2_ref: (TH, C)  bf16           b2_ref: (1, C)  f32
    # o_ref : (TM, C)  out dtype      acc_ref: (TM, C) f32 scratch
    k = pl.program_id(1)

    @pl.when(k == 0)
    def _init():
        acc_ref[...] = jnp.zeros_like(acc_ref)

    # Cast the activation tile to the MXU dtype in-kernel (VPU work hidden
    # under the MXU-bound loop; avoids a wrapper-side HBM rewrite of x).
    x = x_ref[...].astype(w1_ref.dtype)

    # Linear1 chunk on the MXU (f32 accumulation), bias add + ReLU on the VPU.
    h = jnp.dot(x, w1_ref[...], preferred_element_type=jnp.float32)
    h = jnp.maximum(h + b1_ref[...], 0.0)

    # Linear2 chunk; accumulate partial products in the f32 scratch.
    # NOTE: h is fed to the MXU as bf16; error stays inside the test tolerance
    # but grows with H (keep f32 accumulation per chunk, as done here).
    acc_ref[...] += jnp.dot(h.astype(w2_ref.dtype), w2_ref[...],
                            preferred_element_type=jnp.float32)

    @pl.when(k == pl.num_programs(1) - 1)
    def _finalize():
        # Dropout(p=0.0) is the identity.
        # TODO(synk): nonzero dropout would need pltpu.prng_seed /
        # pltpu.prng_random_bits inside the kernel, not a wrapper-side mask.
        o_ref[...] = (acc_ref[...] + b2_ref[...]).astype(o_ref.dtype)


def feed_forward(x, w1, b1, w2, b2, *, tm=512, compute_dtype=jnp.bfloat16):
    """x: (B, T, n_embd) -> (B, T, n_embd). Heavy compute in a Pallas kernel."""
    B, T, C = x.shape
    H = w1.shape[1]
    M = B * T
    out_dtype = x.dtype

    # Lane-dense output: pad C to a multiple of 128 so writebacks are full
    # `vst` (real models with C % 128 == 0 take the no-pad path).
    C_pad = _round_up(C, 128)

    x_bytes = jnp.dtype(x.dtype).itemsize
    out_bytes = jnp.dtype(out_dtype).itemsize
    cd_bytes = jnp.dtype(compute_dtype).itemsize

    budget = _vmem_budget_bytes()
    TM, TH = _choose_tiles(M, C_pad, H, x_bytes, out_bytes, cd_bytes,
                           int(budget * 0.9), tm)
    M_pad = _round_up(M, TM)
    grid_m = M_pad // TM
    grid_h = H // TH

    # ---- prepare operands (weight casts are one-time, tiny HBM passes) ----
    x2d = x.reshape(M, C)
    if M_pad != M or C_pad != C:
        x2d = jnp.pad(x2d, ((0, M_pad - M), (0, C_pad - C)))
    w1c = w1.astype(compute_dtype)
    w2c = w2.astype(compute_dtype)
    b1_2d = b1.reshape(1, H).astype(jnp.float32)
    b2_2d = b2.reshape(1, C).astype(jnp.float32)
    if C_pad != C:
        w1c = jnp.pad(w1c, ((0, C_pad - C), (0, 0)))
        w2c = jnp.pad(w2c, ((0, 0), (0, C_pad - C)))
        b2_2d = jnp.pad(b2_2d, ((0, 0), (0, C_pad - C)))

    weight_bytes = 2 * C * H * cd_bytes * (grid_m if grid_h > 1 else 1)
    cost = pl.CostEstimate(
        flops=4 * M * C * H,              # two matmuls: 2*M*C*H each
        transcendentals=0,
        bytes_accessed=(M * C * x_bytes + weight_bytes + (H + C) * 4
                        + M * C * out_bytes),
    )

    def _call(single_buffer_resident):
        # Streamed weight chunks keep the default double buffer (DMA/MXU
        # overlap); fully resident operands (grid_h == 1, constant index_map)
        # are single-buffered to free VMEM. b2 is always constant.
        res = (1 if (single_buffer_resident and grid_h == 1) else None)
        b2_buf = 1 if single_buffer_resident else None
        in_specs = [
            _block_spec((TM, C_pad), lambda i, k: (i, 0)),        # x: row tiles
            _block_spec((C_pad, TH), lambda i, k: (0, k), res),   # w1 chunk
            _block_spec((1, TH), lambda i, k: (0, k), res),       # b1 chunk
            _block_spec((TH, C_pad), lambda i, k: (k, 0), res),   # w2 chunk
            _block_spec((1, C_pad), lambda i, k: (0, 0), b2_buf), # b2 (const)
        ]
        return pl.pallas_call(
            _ffwd_kernel,
            out_shape=jax.ShapeDtypeStruct((M_pad, C_pad), out_dtype),
            grid_spec=pltpu.PrefetchScalarGridSpec(
                num_scalar_prefetch=0,
                grid=(grid_m, grid_h),
                in_specs=in_specs,
                out_specs=pl.BlockSpec((TM, C_pad), lambda i, k: (i, 0)),
                scratch_shapes=[pltpu.VMEM((TM, C_pad), jnp.float32)],
            ),
            compiler_params=pltpu.CompilerParams(
                # Row tiles are independent -> shardable over v7x's 2 TCs;
                # the H axis is a reduction into acc_ref -> "arbitrary".
                dimension_semantics=("parallel", "arbitrary"),
                vmem_limit_bytes=int(budget),
            ),
            cost_estimate=cost,
        )(x2d, w1c, b1_2d, w2c, b2_2d)

    try:
        out = _call(True)
    except Exception:
        # pipeline_mode=pl.Buffered is newer API; retry with default
        # double-buffered specs so the kernel always runs.
        out = _call(False)

    if M_pad != M or C_pad != C:
        out = out[:M, :C]
    return out.reshape(B, T, C)


if __name__ == "__main__":
    n_embd = 64
    hidden = 4 * n_embd
    B, T = 2, 8

    key = jax.random.PRNGKey(0)
    kx, kw1, kb1, kw2, kb2 = jax.random.split(key, 5)

    # Deterministic synthetic parameters (PyTorch Linear-style fan-in scaling).
    x = jax.random.normal(kx, (B, T, n_embd), dtype=jnp.float32)
    w1 = jax.random.uniform(kw1, (n_embd, hidden), dtype=jnp.float32,
                            minval=-1.0, maxval=1.0) / jnp.sqrt(n_embd)
    b1 = jax.random.uniform(kb1, (hidden,), dtype=jnp.float32,
                            minval=-1.0, maxval=1.0) / jnp.sqrt(n_embd)
    w2 = jax.random.uniform(kw2, (hidden, n_embd), dtype=jnp.float32,
                            minval=-1.0, maxval=1.0) / jnp.sqrt(hidden)
    b2 = jax.random.uniform(kb2, (n_embd,), dtype=jnp.float32,
                            minval=-1.0, maxval=1.0) / jnp.sqrt(hidden)

    y = feed_forward(x, w1, b1, w2, b2)
    y = jax.block_until_ready(y)

    # Reference in plain JAX (same semantics as the PyTorch module, f32).
    ref = jnp.maximum(x.reshape(-1, n_embd) @ w1 + b1, 0.0) @ w2 + b2
    ref = ref.reshape(B, T, n_embd)
    assert y.shape == (B, T, n_embd)
    # bf16 MXU operands with f32 accumulation -> loosened tolerance vs f32 ref.
    assert jnp.allclose(y, ref, atol=5e-2, rtol=5e-2), \
        float(jnp.max(jnp.abs(y - ref)))

    print("KERNEL_OK")
</pallas_src>

<mosaic_0001>
module attributes {stable_mosaic.version = 11 : i64} {
  func.func @_ffwd_kernel(%arg0: i32, %arg1: i32, %arg2: memref<8x128xf32, #tpu.memory_space<vmem>>, %arg3: memref<128x256xbf16, #tpu.memory_space<vmem>>, %arg4: memref<1x256xf32, #tpu.memory_space<vmem>>, %arg5: memref<256x128xbf16, #tpu.memory_space<vmem>>, %arg6: memref<1x128xf32, #tpu.memory_space<vmem>>, %arg7: memref<8x128xf32, #tpu.memory_space<vmem>>, %arg8: memref<8x128xf32, #tpu.memory_space<vmem>>) attributes {dimension_semantics = [#tpu.dimension_semantics<parallel>, #tpu.dimension_semantics<arbitrary>], iteration_bounds = array<i64: 2, 1>, scalar_prefetch = 0 : i64, scratch_operands = 1 : i64, tpu.core_type = #tpu.core_type<tc>, window_params = [{transform_indices = @transform_0, window_bounds = array<i64: 8, 128>}, {pipeline_mode = #tpu.pipeline_mode<synchronous>, transform_indices = @transform_1, window_bounds = array<i64: 128, 256>}, {pipeline_mode = #tpu.pipeline_mode<synchronous>, transform_indices = @transform_2, window_bounds = array<i64: 1, 256>}, {pipeline_mode = #tpu.pipeline_mode<synchronous>, transform_indices = @transform_3, window_bounds = array<i64: 256, 128>}, {pipeline_mode = #tpu.pipeline_mode<synchronous>, transform_indices = @transform_4, window_bounds = array<i64: 1, 128>}, {transform_indices = @transform_5, window_bounds = array<i64: 8, 128>}]} {
    %c0_i32 = arith.constant 0 : i32
    %0 = arith.cmpi eq, %arg1, %c0_i32 : i32
    %1 = arith.extui %0 : i1 to i32
    %c0_i32_0 = arith.constant 0 : i32
    %2 = arith.cmpi ne, %1, %c0_i32_0 : i32
    scf.if %2 {
      %cst_16 = arith.constant 0.000000e+00 : f32
      %21 = vector.broadcast %cst_16 : f32 to vector<8x128xf32>
      %c0_17 = arith.constant 0 : index
      %c0_18 = arith.constant 0 : index
      %22 = vector.load %arg8[%c0_17, %c0_18] : memref<8x128xf32, #tpu.memory_space<vmem>>, vector<8x128xf32>
      tpu.vector_store %arg8[%c0_17, %c0_18], %21 {strides = array<i32>} : memref<8x128xf32, #tpu.memory_space<vmem>>, vector<8x128xf32>,
    } else {
    }
    %c0 = arith.constant 0 : index
    %c0_1 = arith.constant 0 : index
    %3 = vector.load %arg2[%c0, %c0_1] : memref<8x128xf32, #tpu.memory_space<vmem>>, vector<8x128xf32>
    %4 = arith.truncf %3 : vector<8x128xf32> to vector<8x128xbf16>
    %c0_2 = arith.constant 0 : index
    %c0_3 = arith.constant 0 : index
    %5 = vector.load %arg3[%c0_2, %c0_3] : memref<128x256xbf16, #tpu.memory_space<vmem>>, vector<128x256xbf16>
    %cst = arith.constant dense<0.000000e+00> : vector<8x256xf32>
    %6 = tpu.matmul %4, %5, %cst {dimension_numbers = #tpu.dot_dimension_numbers<[1], [0], [0], [1], [0, 0, 1, 1], [], []>} : vector<8x128xbf16>, vector<128x256xbf16>, vector<8x256xf32> -> vector<8x256xf32>
    %c0_4 = arith.constant 0 : index
    %c0_5 = arith.constant 0 : index
    %7 = vector.load %arg4[%c0_4, %c0_5] : memref<1x256xf32, #tpu.memory_space<vmem>>, vector<1x256xf32>
    %8 = vector.broadcast %7 : vector<1x256xf32> to vector<8x256xf32>
    %9 = arith.addf %6, %8 : vector<8x256xf32>
    %cst_6 = arith.constant 0.000000e+00 : f32
    %10 = vector.broadcast %cst_6 : f32 to vector<8x256xf32>
    %11 = arith.maximumf %9, %10 : vector<8x256xf32>
    %c0_7 = arith.constant 0 : index
    %c0_8 = arith.constant 0 : index
    %12 = vector.load %arg8[%c0_7, %c0_8] : memref<8x128xf32, #tpu.memory_space<vmem>>, vector<8x128xf32>
    %13 = arith.truncf %11 : vector<8x256xf32> to vector<8x256xbf16>
    %c0_9 = arith.constant 0 : index
    %c0_10 = arith.constant 0 : index
    %14 = vector.load %arg5[%c0_9, %c0_10] : memref<256x128xbf16, #tpu.memory_space<vmem>>, vector<256x128xbf16>
    %cst_11 = arith.constant dense<0.000000e+00> : vector<8x128xf32>
    %15 = tpu.matmul %13, %14, %cst_11 {dimension_numbers = #tpu.dot_dimension_numbers<[1], [0], [0], [1], [0, 0, 1, 1], [], []>} : vector<8x256xbf16>, vector<256x128xbf16>, vector<8x128xf32> -> vector<8x128xf32>
    %16 = arith.addf %12, %15 : vector<8x128xf32>
    %c0_12 = arith.constant 0 : index
    %c0_13 = arith.constant 0 : index
    %17 = vector.load %arg8[%c0_12, %c0_13] : memref<8x128xf32, #tpu.memory_space<vmem>>, vector<8x128xf32>
    tpu.vector_store %arg8[%c0_12, %c0_13], %16 {strides = array<i32>} : memref<8x128xf32, #tpu.memory_space<vmem>>, vector<8x128xf32>,
    %c0_i32_14 = arith.constant 0 : i32
    %18 = arith.cmpi eq, %arg1, %c0_i32_14 : i32
    %19 = arith.extui %18 : i1 to i32
    %c0_i32_15 = arith.constant 0 : i32
    %20 = arith.cmpi ne, %19, %c0_i32_15 : i32
    scf.if %20 {
      %c0_16 = arith.constant 0 : index
      %c0_17 = arith.constant 0 : index
      %21 = vector.load %arg8[%c0_16, %c0_17] : memref<8x128xf32, #tpu.memory_space<vmem>>, vector<8x128xf32>
      %c0_18 = arith.constant 0 : index
      %c0_19 = arith.constant 0 : index
      %22 = vector.load %arg6[%c0_18, %c0_19] : memref<1x128xf32, #tpu.memory_space<vmem>>, vector<1x128xf32>
      %23 = vector.broadcast %22 : vector<1x128xf32> to vector<8x128xf32>
      %24 = arith.addf %21, %23 : vector<8x128xf32>
      %c0_20 = arith.constant 0 : index
      %c0_21 = arith.constant 0 : index
      %25 = vector.load %arg7[%c0_20, %c0_21] : memref<8x128xf32, #tpu.memory_space<vmem>>, vector<8x128xf32>
      tpu.vector_store %arg7[%c0_20, %c0_21], %24 {strides = array<i32>} : memref<8x128xf32, #tpu.memory_space<vmem>>, vector<8x128xf32>,
    } else {
    }
    return
  }
  func.func @transform_0(%arg0: i32, %arg1: i32) -> (i32, i32) {
    %c0_i32 = arith.constant 0 : i32
    %c0_i32_0 = arith.constant 0 : i32
    return %arg0, %c0_i32 : i32, i32
  }
  func.func @transform_1(%arg0: i32, %arg1: i32) -> (i32, i32) {
    %c0_i32 = arith.constant 0 : i32
    %c0_i32_0 = arith.constant 0 : i32
    return %c0_i32, %arg1 : i32, i32
  }
  func.func @transform_2(%arg0: i32, %arg1: i32) -> (i32, i32) {
    %c0_i32 = arith.constant 0 : i32
    %c0_i32_0 = arith.constant 0 : i32
    return %c0_i32, %arg1 : i32, i32
  }
  func.func @transform_3(%arg0: i32, %arg1: i32) -> (i32, i32) {
    %c0_i32 = arith.constant 0 : i32
    %c0_i32_0 = arith.constant 0 : i32
    return %arg1, %c0_i32 : i32, i32
  }
  func.func @transform_4(%arg0: i32, %arg1: i32) -> (i32, i32) {
    %c0_i32 = arith.constant 0 : i32
    %c0_i32_0 = arith.constant 0 : i32
    %c0_i32_1 = arith.constant 0 : i32
    return %c0_i32, %c0_i32_0 : i32, i32
  }
  func.func @transform_5(%arg0: i32, %arg1: i32) -> (i32, i32) {
    %c0_i32 = arith.constant 0 : i32
    %c0_i32_0 = arith.constant 0 : i32
    return %arg0, %c0_i32 : i32, i32
  }
}

module attributes {stable_mosaic.version = 11 : i64} {
  func.func @_ffwd_kernel(%arg0: i32, %arg1: i32, %arg2: memref<8x128xf32, #tpu.memory_space<vmem>>, %arg3: memref<128x256xbf16, #tpu.memory_space<vmem>>, %arg4: memref<1x256xf32, #tpu.memory_space<vmem>>, %arg5: memref<256x128xbf16, #tpu.memory_space<vmem>>, %arg6: memref<1x128xf32, #tpu.memory_space<vmem>>, %arg7: memref<8x128xf32, #tpu.memory_space<vmem>>, %arg8: memref<8x128xf32, #tpu.memory_space<vmem>>) attributes {dimension_semantics = [#tpu.dimension_semantics<parallel>, #tpu.dimension_semantics<arbitrary>], iteration_bounds = array<i64: 2, 1>, scalar_prefetch = 0 : i64, scratch_operands = 1 : i64, tpu.core_type = #tpu.core_type<tc>, window_params = [{transform_indices = @transform_0, window_bounds = array<i64: 8, 128>}, {transform_indices = @transform_1, window_bounds = array<i64: 128, 256>}, {transform_indices = @transform_2, window_bounds = array<i64: 1, 256>}, {transform_indices = @transform_3, window_bounds = array<i64: 256, 128>}, {pipeline_mode = #tpu.pipeline_mode<synchronous>, transform_indices = @transform_4, window_bounds = array<i64: 1, 128>}, {transform_indices = @transform_5, window_bounds = array<i64: 8, 128>}]} {
    %c0_i32 = arith.constant 0 : i32
    %0 = arith.cmpi eq, %arg1, %c0_i32 : i32
    %1 = arith.extui %0 : i1 to i32
    %c0_i32_0 = arith.constant 0 : i32
    %2 = arith.cmpi ne, %1, %c0_i32_0 : i32
    scf.if %2 {
      %cst_16 = arith.constant 0.000000e+00 : f32
      %21 = vector.broadcast %cst_16 : f32 to vector<8x128xf32>
      %c0_17 = arith.constant 0 : index
      %c0_18 = arith.constant 0 : index
      %22 = vector.load %arg8[%c0_17, %c0_18] : memref<8x128xf32, #tpu.memory_space<vmem>>, vector<8x128xf32>
      tpu.vector_store %arg8[%c0_17, %c0_18], %21 {strides = array<i32>} : memref<8x128xf32, #tpu.memory_space<vmem>>, vector<8x128xf32>,
    } else {
    }
    %c0 = arith.constant 0 : index
    %c0_1 = arith.constant 0 : index
    %3 = vector.load %arg2[%c0, %c0_1] : memref<8x128xf32, #tpu.memory_space<vmem>>, vector<8x128xf32>
    %4 = arith.truncf %3 : vector<8x128xf32> to vector<8x128xbf16>
    %c0_2 = arith.constant 0 : index
    %c0_3 = arith.constant 0 : index
    %5 = vector.load %arg3[%c0_2, %c0_3] : memref<128x256xbf16, #tpu.memory_space<vmem>>, vector<128x256xbf16>
    %cst = arith.constant dense<0.000000e+00> : vector<8x256xf32>
    %6 = tpu.matmul %4, %5, %cst {dimension_numbers = #tpu.dot_dimension_numbers<[1], [0], [0], [1], [0, 0, 1, 1], [], []>} : vector<8x128xbf16>, vector<128x256xbf16>, vector<8x256xf32> -> vector<8x256xf32>
    %c0_4 = arith.constant 0 : index
    %c0_5 = arith.constant 0 : index
    %7 = vector.load %arg4[%c0_4, %c0_5] : memref<1x256xf32, #tpu.memory_space<vmem>>, vector<1x256xf32>
    %8 = vector.broadcast %7 : vector<1x256xf32> to vector<8x256xf32>
    %9 = arith.addf %6, %8 : vector<8x256xf32>
    %cst_6 = arith.constant 0.000000e+00 : f32
    %10 = vector.broadcast %cst_6 : f32 to vector<8x256xf32>
    %11 = arith.maximumf %9, %10 : vector<8x256xf32>
    %c0_7 = arith.constant 0 : index
    %c0_8 = arith.constant 0 : index
    %12 = vector.load %arg8[%c0_7, %c0_8] : memref<8x128xf32, #tpu.memory_space<vmem>>, vector<8x128xf32>
    %13 = arith.truncf %11 : vector<8x256xf32> to vector<8x256xbf16>
    %c0_9 = arith.constant 0 : index
    %c0_10 = arith.constant 0 : index
    %14 = vector.load %arg5[%c0_9, %c0_10] : memref<256x128xbf16, #tpu.memory_space<vmem>>, vector<256x128xbf16>
    %cst_11 = arith.constant dense<0.000000e+00> : vector<8x128xf32>
    %15 = tpu.matmul %13, %14, %cst_11 {dimension_numbers = #tpu.dot_dimension_numbers<[1], [0], [0], [1], [0, 0, 1, 1], [], []>} : vector<8x256xbf16>, vector<256x128xbf16>, vector<8x128xf32> -> vector<8x128xf32>
    %16 = arith.addf %12, %15 : vector<8x128xf32>
    %c0_12 = arith.constant 0 : index
    %c0_13 = arith.constant 0 : index
    %17 = vector.load %arg8[%c0_12, %c0_13] : memref<8x128xf32, #tpu.memory_space<vmem>>, vector<8x128xf32>
    tpu.vector_store %arg8[%c0_12, %c0_13], %16 {strides = array<i32>} : memref<8x128xf32, #tpu.memory_space<vmem>>, vector<8x128xf32>,
    %c0_i32_14 = arith.constant 0 : i32
    %18 = arith.cmpi eq, %arg1, %c0_i32_14 : i32
    %19 = arith.extui %18 : i1 to i32
    %c0_i32_15 = arith.constant 0 : i32
    %20 = arith.cmpi ne, %19, %c0_i32_15 : i32
    scf.if %20 {
      %c0_16 = arith.constant 0 : index
      %c0_17 = arith.constant 0 : index
      %21 = vector.load %arg8[%c0_16, %c0_17] : memref<8x128xf32, #tpu.memory_space<vmem>>, vector<8x128xf32>
      %c0_18 = arith.constant 0 : index
      %c0_19 = arith.constant 0 : index
      %22 = vector.load %arg6[%c0_18, %c0_19] : memref<1x128xf32, #tpu.memory_space<vmem>>, vector<1x128xf32>
      %23 = vector.broadcast %22 : vector<1x128xf32> to vector<8x128xf32>
      %24 = arith.addf %21, %23 : vector<8x128xf32>
      %c0_20 = arith.constant 0 : index
      %c0_21 = arith.constant 0 : index
      %25 = vector.load %arg7[%c0_20, %c0_21] : memref<8x128xf32, #tpu.memory_space<vmem>>, vector<8x128xf32>
      tpu.vector_store %arg7[%c0_20, %c0_21], %24 {strides = array<i32>} : memref<8x128xf32, #tpu.memory_space<vmem>>, vector<8x128xf32>,
    } else {
    }
    return
  }
  func.func @transform_0(%arg0: i32, %arg1: i32) -> (i32, i32) {
    %c0_i32 = arith.constant 0 : i32
    %c0_i32_0 = arith.constant 0 : i32
    return %arg0, %c0_i32 : i32, i32
  }
  func.func @transform_1(%arg0: i32, %arg1: i32) -> (i32, i32) {
    %c0_i32 = arith.constant 0 : i32
    %c0_i32_0 = arith.constant 0 : i32
    return %c0_i32, %arg1 : i32, i32
  }
  func.func @transform_2(%arg0: i32, %arg1: i32) -> (i32, i32) {
    %c0_i32 = arith.constant 0 : i32
    %c0_i32_0 = arith.constant 0 : i32
    return %c0_i32, %arg1 : i32, i32
  }
  func.func @transform_3(%arg0: i32, %arg1: i32) -> (i32, i32) {
    %c0_i32 = arith.constant 0 : i32
    %c0_i32_0 = arith.constant 0 : i32
    return %arg1, %c0_i32 : i32, i32
  }
  func.func @transform_4(%arg0: i32, %arg1: i32) -> (i32, i32) {
    %c0_i32 = arith.constant 0 : i32
    %c0_i32_0 = arith.constant 0 : i32
    %c0_i32_1 = arith.constant 0 : i32
    return %c0_i32, %c0_i32_0 : i32, i32
  }
  func.func @transform_5(%arg0: i32, %arg1: i32) -> (i32, i32) {
    %c0_i32 = arith.constant 0 : i32
    %c0_i32_0 = arith.constant 0 : i32
    return %arg0, %c0_i32 : i32, i32
  }
}

</mosaic_0001>

<bundles_post_ra>
// kernel: tpu_custom_call.1
= control target key start
LH: loop header
LB: loop body
LE: loop exit
PB: predicated region body
PF: predicated region fallthrough
CT: control target
= control target key end

     0   :  { %s1389_s0 = inlined_call_operand.hbm [shape: f32[16,128], index: 0, kind: input, shape index: {}]   ;;  %s1390_s1 = inlined_call_operand.hbm [shape: bf16[128,256], index: 1, kind: input, shape index: {}]   ;;  %s1391_s2 = inlined_call_operand.vmem [shape: f32[1,256], index: 2, kind: input, shape index: {}]   ;;  %s1392_s3 = inlined_call_operand.hbm [shape: bf16[256,128], index: 3, kind: input, shape index: {}]   ;;  %s1393_s4 = inlined_call_operand.vmem [shape: f32[1,128], index: 4, kind: input, shape index: {}]   ;;  %s1394_s5 = inlined_call_operand.hbm [shape: f32[16,128], index: 5, kind: output, shape index: {}]  }
   0x1   :  { %1398 = sst [smem:[#allocation13_spill]] %s1390_s1 }
   0x2   :  { %10 = vsyncpa [#allocation4], 0 }
   0x3   :  { %12 = vsyncpa [#allocation4 + $0x1], 0 }
   0x4   :  { %13 = vsyncpa [#allocation7], 0 }
   0x5   :  { %14 = vsyncpa [#allocation5], 0 }
   0x6   :  { %16 = vsyncpa [#allocation5 + $0x1], 0  ;;  %s1196_s18 = smov 0   ;;  %s1198_s19 = smov 0  }
   0x7   :  { %s1200_s20 = smov 0   ;;  %s1202_s21 = smov 0  }
   0x8   :  { %s1204_s22 = smov 0   ;;  %s1206_s23 = smov 0  }
   0x9 LB: > { %s790_s24 = sadd.s32 4294967295, %s1155_s23   ;;  %s791_s25 = sadd.s32 4294967294, %s1155_s23   ;;  %s1155_s23 = sphi %s1206_s23, %s22_s23   ;;  %s1151_s22 = sphi %s1204_s22, %s1416_s22   ;;  %s1147_s21 = sphi %s1202_s21, %s1415_s21   ;;  %s1143_s20 = sphi %s1200_s20, %s1414_s20   ;;  %s1139_s19 = sphi %s1198_s19, %s1413_s19   ;;  %s1135_s18 = sphi %s1196_s18, %s1412_s18  }
   0xa   : > { %p54_p0 = scmp.ne.s32.totalorder %s1139_s19, %s1135_s18  ;;  %p1230_p1 = scmp.eq.s32.totalorder %s790_s24, 0 }
   0xb   : > { %p1234_p2 = scmp.eq.s32.totalorder %s790_s24, 1  ;;  %p183_p3 = scmp.eq.s32.totalorder %s791_s25, 1 }
   0xc   : > { %s1399_s26 = scalar_select %p1230_p1, 1, 0 }
   0xd   : > { %p1240_p4 = por %p1230_p1, %p54_p0  ;;  %p792_p5 = scmp.ge.s32.totalorder %s1155_s23, 1 }
   0xe   : > { %p1245_p6 = por %p183_p3, %p54_p0  ;;  %p190_p7 = scmp.lt.s32.totalorder %s1155_s23, 3 }
   0xf   : > { %s1401_s28 = scalar_select %p1240_p4, 1, 0 }
  0x10   : > { %s1402_s29 = scalar_select %p1245_p6, 1, 0 }
  0x11   : > { %p1250_p8 = pnand %p792_p5, %p190_p7  ;;  %s1157_s6 = smov [#allocation6]  }
  0x12   : > { %s205_s7 = sshll.u32 %s1157_s6, 4  ;;  %s1158_s9 = smov [#allocation8]   ;;  %s206_s7 = int_to_ptr.vmem [resolvable:$true] %s205_s7 }
  0x13   : > { %p875_p9 = pneg %p1250_p8  ;;  %s229_s10 = sshll.u32 %s1158_s9, 4  ;;  %s230_s10 = int_to_ptr.vmem [resolvable:$true] %s229_s10 }
  0x14   : > { %s1002_s11 = scalar_lea.vmem %s206_s7, 2048  ;;  %p1010_p5 = scmp.lt.s32.totalorder %s206_s7, %s206_s7 }
  0x15   : > { %p1259_p11 = pnand %p875_p9, %p1230_p1  ;;  %p1003_p13 = scmp.ne.s32.totalorder %s206_s7, %s1002_s11 }
  0x16   : > { %p1011_p7 = scmp.lt.s32.totalorder %s1002_s11, %s1002_s11 }
  0x17   : > { %p993_p12 = pneg %p1259_p11 }
  0x18   : > { %p1012_p10 = por %p1011_p7, %p1010_p5 }
  0x19   : > { %p1005_p0 = pnand %p1003_p13, %p993_p12 }
  0x1b   : > { %p1006_p3 = pneg %p1005_p0 }
  0x1d   : > { %p1013_p9 = pnand %p1012_p10, %p1006_p3 }
  0x1f   : > { %1016 = shalt.err (!%p1013_p9)
}
  0x20   : > { %s1159_s12 = smov 128   ;;  %s1160_s13 = smov 8  }
  0x21   : > { %s1405_s1 = sld [smem:[#allocation13_spill]]  ;;  %s1028_s16 = scalar_lea.vmem %s230_s10, 2048 }
  0x22   : > { %p1029_p6 = scmp.ne.s32.totalorder %s230_s10, %s1028_s16  ;;  %p1036_p1 = scmp.lt.s32.totalorder %s230_s10, %s230_s10 }
  0x23   : > { %p1037_p4 = scmp.lt.s32.totalorder %s1028_s16, %s1028_s16 }
  0x24   : > { %p1031_p13 = pnand %p1029_p6, %p993_p12 }
  0x25   : > { %p1038_p5 = por %p1037_p4, %p1036_p1 }
  0x26   : > { %p1032_p0 = pneg %p1031_p13 }
  0x27   : > { %878 = dma.hbm_to_vmem [thread:$0]  (!%p1259_p11), %s1405_s1, 2048, %s206_s7, [#allocation7], %s1159_s12, %s1159_s12, %s1160_s13  }
  0x28   : > { %p1039_p10 = pnand %p1038_p5, %p1032_p0 }
  0x2a   : > { %1042 = shalt.err (!%p1039_p10)
}
  0x2b   : > { %s1161_s17 = smov 64   ;;  %s1162_s24 = smov 4  }
  0x2c   : > { %881 = dma.hbm_to_vmem [thread:$0]  (!%p1259_p11), %s1392_s3, 2048, %s230_s10, [#allocation7], %s1161_s17, %s1161_s17, %s1162_s24  }
  0x2d   : > { %s34_s7 = sadd.s32 1, %s1151_s22  ;;  %s41_s9 = sadd.s32 1, %s1143_s20 }
  0x2e   : > { %p36_p1 = scmp.ge.s32.totalorder %s34_s7, 2  ;;  %p48_p4 = scmp.ne.s32.totalorder %s1143_s20, %s1139_s19 }
  0x2f   : > { %p49_p6 = scmp.eq.s32.totalorder %s1155_s23, 0  ;;  %p892_p12 = scmp.lt.s32.totalorder %s1155_s23, 2 }
  0x30   : > { %s1418_s7 = smov (%p36_p1, %s34_s7), 0  ;;  %p1291_p7 = por %p1234_p2, %p48_p4 }
  0x31   : > { %p50_p3 = por %p49_p6, %p48_p4  ;;  %s38_s8 = ssub.s32 %s1151_s22, %s1418_s7 }
  0x32   : > { %s246_s12 = sand.u32 1, %s1143_s20   ;;  %p39_p9 = scmp.eq.s32.totalorder %s38_s8, 0 }
  0x33   : > { %s797_s10 = sshll.u32 %s246_s12, 3  ;;  %s798_s13 = sshll.u32 %s1151_s22, 7 }
  0x34   : > { %s1300_s14 = scalar_select %p39_p9, %s1143_s20, %s41_s9  }
  0x35   : > { %s255_s17 = scalar_lea.hbm %s1389_s0, %s798_s13  ;;  %s250_s24 = scalar_lea.vmem [#allocation3], %s797_s10 }
  0x36   : > { %s257_s25 = sshll.u32 %s250_s24, 4  ;;  %p1307_p11 = pnand %p892_p12, %p50_p3  ;;  %s258_s25 = int_to_ptr.vmem [resolvable:$true] %s257_s25 }
  0x37   : > { %s247_s6 = scalar_lea.sflag [#allocation4], %s246_s12  ;;  %s1056_s8 = scalar_lea.vmem %s258_s25, 128 }
  0x38   : > { %p1045_p2 = pneg %p1307_p11  ;;  %p1057_p13 = scmp.ne.s32.totalorder %s258_s25, %s1056_s8 }
  0x39   : > { %s1163_s9 = smov [#allocation3]  }
  0x3a   : > { %p1059_p0 = pnand %p1057_p13, %p1045_p2  ;;  %s1061_s1 = sshll.u32 %s1163_s9, 4  ;;  %s1062_s1 = int_to_ptr.vmem [resolvable:$false] %s1061_s1 }
  0x3b   : > { %s1063_s13 = scalar_lea.vmem %s1062_s1, 256  ;;  %p1064_p10 = scmp.lt.s32.totalorder %s258_s25, %s1062_s1 }
  0x3c   : > { %p1060_p5 = pneg %p1059_p0  ;;  %p1065_p1 = scmp.lt.s32.totalorder %s1063_s13, %s1056_s8 }
  0x3e   : > { %p1066_p4 = por %p1065_p1, %p1064_p10 }
  0x40   : > { %p1067_p6 = pnand %p1066_p4, %p1060_p5 }
  0x42   : > { %1070 = shalt.err (!%p1067_p6)
}
  0x43   : > { %885 = dma.hbm_to_vmem [thread:$0]  (!%p1307_p11), %s255_s17, 128, %s258_s25, %s247_s6  }
  0x44   : > { %266 = sbr.rel (%p1250_p8) target bundleno = 524 (0x20c), region = 40  ;;  %s1318_s12 = sand.u32 (!%p1250_p8), 1, %s1139_s19  }
  0x45   : > { %s800_s10 = sshll.u32 (!%p1250_p8), %s1318_s12, 3  ;;  %s269_s15 = scalar_lea.sflag (!%p1250_p8), [#allocation4], %s1318_s12 }
  0x46   : > { %s1324_s1 = scalar_lea.vmem (!%p1250_p8), [#allocation3], %s800_s10  ;;  %p1408_p12 = scmp.ne.s32.totalorder (!%p1250_p8), %s1401_s28, 0 }
  0x49   : > { %1122 = dma.done.wait (%p1408_p12), %s269_s15, 128  }
  0x4a   : > { %1124 = vsyncadd (%p1408_p12), %s269_s15, 4294967168  ;;  %p1409_p3 = scmp.ne.s32.totalorder %s1399_s26, 0 }
  0x4c   : > { %1126 = dma.done.wait (%p1409_p3), [#allocation7], 4096  }
  0x4d   : > { %1128 = vsyncadd (%p1409_p3), [#allocation7], 4294963200  ;;  %v1164_v0 = vmov 0   ;;  %v951_v1 = vld [vmem:[#allocation6 + $0x74] ss:$8 sps:$4 sm:$0xff]   ;;  %v979_v15 = vld [vmem:[#allocation8 + $0x68] sm:$0xff]   ;;  %v344_v35 = vlaneseq }
  0x4e   : > { %466 = vmatprep.mubr.bf16.mxu0 %v1164_v0  ;;  %v953_v2 = vld [vmem:[#allocation6 + $0x70] ss:$8 sps:$4 sm:$0xff]   ;;  %434 = vmatprep.subr.bf16.mxu0 %v951_v1  ;;  %v954_v3 = vld [vmem:[#allocation6 + $0x64] ss:$8 sps:$4 sm:$0xff]   ;;  %v956_v4 = vld [vmem:[#allocation6 + $0x60] ss:$8 sps:$4 sm:$0xff]  }
  0x4f   : > { %435 = vmatpush1.bf16.msra.mxu0 %v953_v2  ;;  %v957_v5 = vld [vmem:[#allocation6 + $0x54] ss:$8 sps:$4 sm:$0xff]   ;;  %v959_v6 = vld [vmem:[#allocation6 + $0x50] ss:$8 sps:$4 sm:$0xff]   ;;  %v960_v7 = vld [vmem:[#allocation6 + $0x44] ss:$8 sps:$4 sm:$0xff]  }
  0x50   : > { %436 = vmatprep.subr.bf16.mxu0 %v954_v3  ;;  %v962_v8 = vld [vmem:[#allocation6 + $0x40] ss:$8 sps:$4 sm:$0xff]   ;;  %v963_v9 = vld [vmem:[#allocation6 + $0x34] ss:$8 sps:$4 sm:$0xff]   ;;  %v965_v12 = vld [vmem:[#allocation6 + $0x30] ss:$8 sps:$4 sm:$0xff]  }
  0x51   : > { %v975_v10 = vld [vmem:[#allocation8 + $0x78] sm:$0xff]   ;;  %v977_v13 = vld [vmem:[#allocation8 + $0x70] sm:$0xff]   ;;  %v966_v16 = vld [vmem:[#allocation6 + $0x24] ss:$8 sps:$4 sm:$0xff]   ;;  %v345_v36 = vshrl.u32 %v344_v35, 7  ;;  %s838_s17 = sshll.u32 %s1147_s21, 7 }
  0x52   : > { %v976_v11 = vld [vmem:[#allocation8 + $0x38] sm:$0xff]   ;;  %841 = vmatprep.subr.bf16.mxu1 %v975_v10  ;;  %v978_v14 = vld [vmem:[#allocation8 + $0x30] sm:$0xff]   ;;  %v968_v17 = vld [vmem:[#allocation6 + $0x20] ss:$8 sps:$4 sm:$0xff]   ;;  %s310_s24 = scalar_lea.vmem [#allocation9], %s800_s10  ;;  %s1347_s8 = scalar_lea.hbm %s1394_s5, %s838_s17 }
  0x53   : > { %437 = vmatpush1.bf16.msra.mxu0 %v956_v4  ;;  %842 = vmatpush3.bf16.msra.mxu1 %v976_v11  ;;  %v980_v18 = vld [vmem:[#allocation8 + $0x28] sm:$0xff]   ;;  %v981_v19 = vld [vmem:[#allocation8 + $0x60] sm:$0xff]   ;;  %v969_v20 = vld [vmem:[#allocation6 + $0x14] ss:$8 sps:$4 sm:$0xff]   ;;  %v346_v37 = vsub.s32 0, %v345_v36  ;;  %v350_v39 = vsub.s32 1, %v345_v36 }
  0x54   : > { %438 = vmatprep.subr.bf16.mxu0 %v957_v5  ;;  %843 = vmatprep.subr.bf16.mxu1 %v977_v13  ;;  %v971_v21 = vld [vmem:[#allocation6 + $0x10] ss:$8 sps:$4 sm:$0xff]   ;;  %v972_v22 = vld [vmem:[#allocation6 + $0x4] ss:$8 sps:$4 sm:$0xff]   ;;  %v974_v26 = vld [vmem:[#allocation6] ss:$8 sps:$4 sm:$0xff]  }
  0x55   : > { %v982_v23 = vld [vmem:[#allocation8 + $0x20] sm:$0xff]   ;;  %v983_v24 = vld [vmem:[#allocation8 + $0x58] sm:$0xff]   ;;  %v985_v28 = vld [vmem:[#allocation8 + $0x50] sm:$0xff]   ;;  %s677_s25 = sshll.u32 %s310_s24, 4  ;;  %s664_s9 = scalar_lea.sflag [#allocation5], %s1318_s12  ;;  %s678_s25 = int_to_ptr.vmem [resolvable:$true] %s677_s25 }
  0x56   : > { %v984_v25 = vld [vmem:[#allocation8 + $0x18] sm:$0xff]   ;;  %v986_v30 = vld [vmem:[#allocation8 + $0x10] sm:$0xff]   ;;  %v987_v31 = vld [vmem:[#allocation8 + $0x48] sm:$0xff]   ;;  %s1071_s13 = scalar_lea.vmem %s678_s25, 128  ;;  %s1165_s21 = smov [#allocation9]  }
  0x57   : > { %439 = vmatpush1.bf16.msra.mxu0 %v959_v6  ;;  %844 = vmatpush3.bf16.msra.mxu1 %v978_v14  ;;  %v324_v27 = vld [vmem:[%s1324_s1] sm:$0xff]  ;;  %v988_v32 = vld [vmem:[#allocation8 + $0x8] sm:$0xff]   ;;  %v989_v33 = vld [vmem:[#allocation8 + $0x40] sm:$0xff]   ;;  %p1072_p8 = scmp.ne.s32.totalorder %s678_s25, %s1071_s13  ;;  %s1075_s10 = sshll.u32 %s1165_s21, 4  ;;  %s1076_s10 = int_to_ptr.vmem [resolvable:$false] %s1075_s10 }
  0x58   : > { %440 = vmatprep.subr.bf16.mxu0 %v960_v7  ;;  %845 = vmatprep.subr.bf16.mxu1 %v979_v15  ;;  %v325_v29 = vpack.c.bf16 %v324_v27, %v324_v27  ;;  %v990_v34 = vld [vmem:[#allocation8] sm:$0xff]   ;;  %v342_v38 = vld [vmem:[%s1391_s2] sm:$0x3]  ;;  %s1077_s15 = scalar_lea.vmem %s1076_s10, 256  ;;  %p1078_p2 = scmp.lt.s32.totalorder %s678_s25, %s1076_s10 }
  0x59   : > { %v347_v40 = vrot.slane %v342_v38, %v346_v37  ;;  %v351_v41 = vrot.slane %v342_v38, %v350_v39  ;;  %v836_v54 = vld [vmem:[%s1393_s4] ss:$0 sm:$0xff]  ;;  %p1073_p9 = pnand %p1072_p8, %p1291_p7  ;;  %p1079_p13 = scmp.lt.s32.totalorder %s1077_s15, %s1071_s13 }
  0x5b   : > { %441 = vmatpush1.bf16.msra.mxu0 %v962_v8  ;;  %846 = vmatpush3.bf16.msra.mxu1 %v980_v18  ;;  %p1074_p11 = pneg %p1073_p9  ;;  %p1080_p0 = por %p1079_p13, %p1078_p2 }
  0x5c   : > { %442 = vmatprep.subr.bf16.mxu0 %v963_v9  ;;  %847 = vmatprep.subr.bf16.mxu1 %v981_v19 }
  0x5d   : > { %p1081_p5 = pnand %p1080_p0, %p1074_p11 }
  0x5f   : > { %443 = vmatpush1.bf16.msra.mxu0 %v965_v12  ;;  %848 = vmatpush3.bf16.msra.mxu1 %v982_v23 }
  0x60   : > { %444 = vmatprep.subr.bf16.mxu0 %v966_v16  ;;  %849 = vmatprep.subr.bf16.mxu1 %v983_v24 }
  0x63   : > { %445 = vmatpush1.bf16.msra.mxu0 %v968_v17  ;;  %850 = vmatpush3.bf16.msra.mxu1 %v984_v25 }
  0x64   : > { %446 = vmatprep.subr.bf16.mxu0 %v969_v20  ;;  %851 = vmatprep.subr.bf16.mxu1 %v985_v28 }
  0x67   : > { %447 = vmatpush1.bf16.msra.mxu0 %v971_v21  ;;  %852 = vmatpush3.bf16.msra.mxu1 %v986_v30 }
  0x68   : > { %448 = vmatprep.subr.bf16.mxu0 %v972_v22  ;;  %853 = vmatprep.subr.bf16.mxu1 %v987_v31 }
  0x6b   : > { %449 = vmatpush1.bf16.msra.mxu0 %v974_v26  ;;  %854 = vmatpush3.bf16.msra.mxu1 %v988_v32 }
  0x6c   : > { %855 = vmatprep.subr.bf16.mxu1 %v989_v33 }
  0x6e   : > { %467 = vmatmul.mubr.bf16.vlgmr.msra.gmra.mxu0 %v325_v29 }
  0x6f   : > { %856 = vmatpush3.bf16.msra.mxu1 %v990_v34 }
 0x12e   : > { %v468_v42 = vpop.f32.mrf.mxu0 }
 0x12f   : > { %v469_v43 = vadd.f32 %v468_v42, %v347_v40 }
 0x130   : > { %v470_v44 = vpop.f32.mrf.mxu0 }
 0x131   : > { %v471_v45 = vadd.f32 %v470_v44, %v351_v41  ;;  %v475_v46 = vmax.f32 %v469_v43, 0.0 }
 0x132   : > { %v472_v47 = vpop.f32.mrf.mxu0 }
 0x133   : > { %v476_v48 = vmax.f32 %v471_v45, 0.0  ;;  %v478_v51 = vpack.c.bf16 %v475_v46, %v475_v46 }
 0x134   : > { %v473_v49 = vpop.f32.mrf.mxu0 }
 0x135   : > { %v479_v50 = vpack.c.bf16 %v476_v48, %v476_v48 }
 0x137   : > { %640 = vmatprep.mubr.bf16.mxu1 %v479_v50 }
 0x138   : > { %641 = vmatmul.mubr.bf16.vlgmr.msra.gmra.mxu1 %v478_v51 }
 0x1f8   : > { %v857_v52 = vpop.f32.mrf.mxu1 }
 0x1fa   : > { %v858_v53 = vpop.f32.mrf.mxu1 }
 0x1fb   : > { %v859_v55 = vadd.f32 %v858_v53, %v857_v52 }
 0x1fc   : > { %v860_v56 = vpop.f32.mrf.mxu1 }
 0x1fd   : > { %v661_v57 = vadd.f32 %v859_v55, %v836_v54 }
 0x1fe   : > { %v861_v58 = vpop.f32.mrf.mxu1 }
 0x1ff   : > { %662 = vst [vmem:[%s310_s24] sm:$0xff] %v661_v57 }
 0x200   : > { %1084 = shalt.err (!%p1081_p5)
}
 0x201   : > { %s1085_s1 = scalar_lea.hbm %s1347_s8, 128  ;;  %s1089_s28 = scalar_lea.hbm %s1394_s5, 256 }
 0x202   : > { %p1086_p10 = scmp.ne.s32.totalorder %s1347_s8, %s1085_s1  ;;  %p1090_p6 = scmp.lt.s32.totalorder %s1347_s8, %s1394_s5 }
 0x203   : > { %p1091_p12 = scmp.lt.s32.totalorder %s1089_s28, %s1085_s1 }
 0x204   : > { %p1087_p1 = pnand %p1086_p10, %p1291_p7 }
 0x205   : > { %p1092_p3 = por %p1091_p12, %p1090_p6 }
 0x206   : > { %p1088_p4 = pneg %p1087_p1 }
 0x208   : > { %p1093_p8 = pnand %p1092_p3, %p1088_p4 }
 0x20a   : > { %1096 = shalt.err (!%p1093_p8)
}
 0x20b   : > { %873 = dma.vmem_to_hbm [thread:$0]  (%p1291_p7), %s678_s25, 128, %s1347_s8, %s664_s9  }
 0x20c PF: > { %s689_s17 = sand.u32 1, %s1135_s18   ;;  %p1410_p9 = scmp.ne.s32.totalorder %s1402_s29, 0 }
 0x20d   : > { %p1411_p11 = scmp.ge.s32.totalorder %s1155_s23, 2  ;;  %s690_s24 = scalar_lea.sflag [#allocation5], %s689_s17 }
 0x20f   : > { %p887_p2 = pnand %p1411_p11, %p1410_p9 }
 0x211   : > { %p888_p13 = pneg %p887_p2 }
 0x213   : > { %1130 = dma.done.wait (%p888_p13), %s690_s24, 128  }
 0x214   : > { %1132 = vsyncadd (%p888_p13), %s690_s24, 4294967168  ;;  %s22_s23 = sadd.s32 1, %s1155_s23   ;;  %s1412_s18 = smov %s1139_s19 }
 0x215   : > { %p19_p0 = scmp.ge.s32.totalorder %s22_s23, 4   ;;  %s1413_s19 = smov %s1143_s20 }
 0x216   : > { %s1414_s20 = smov %s1300_s14  ;;  %s1415_s21 = smov %s1151_s22 }
 0x217   : > { %s1416_s22 = smov %s1418_s7  ;;  %21 = sbr.rel (!%p19_p0) target bundleno = 9 (0x9), region = 106 }
 0x21c   :  { %695 = vsyncpa [#allocation4], 1 }
 0x21d   :  { %697 = vsyncpa [#allocation4 + $0x1], 1 }
 0x21e   :  { %698 = vsyncpa [#allocation7], 1 }
 0x21f   :  { %699 = vsyncpa [#allocation5], 1 }
 0x220   :  { %701 = vsyncpa [#allocation5 + $0x1], 1 }

// kernel: tpu_custom_call.1
= control target key start
LH: loop header
LB: loop body
LE: loop exit
PB: predicated region body
PF: predicated region fallthrough
CT: control target
= control target key end

     0   :  { %s1389_s0 = inlined_call_operand.hbm [shape: f32[16,128], index: 0, kind: input, shape index: {}]   ;;  %s1390_s1 = inlined_call_operand.hbm [shape: bf16[128,256], index: 1, kind: input, shape index: {}]   ;;  %s1391_s2 = inlined_call_operand.vmem [shape: f32[1,256], index: 2, kind: input, shape index: {}]   ;;  %s1392_s3 = inlined_call_operand.hbm [shape: bf16[256,128], index: 3, kind: input, shape index: {}]   ;;  %s1393_s4 = inlined_call_operand.vmem [shape: f32[1,128], index: 4, kind: input, shape index: {}]   ;;  %s1394_s5 = inlined_call_operand.hbm [shape: f32[16,128], index: 5, kind: output, shape index: {}]  }
   0x1   :  { %1398 = sst [smem:[#allocation13_spill]] %s1390_s1 }
   0x2   :  { %10 = vsyncpa [#allocation4], 0 }
   0x3   :  { %12 = vsyncpa [#allocation4 + $0x1], 0 }
   0x4   :  { %13 = vsyncpa [#allocation7], 0 }
   0x5   :  { %14 = vsyncpa [#allocation5], 0 }
   0x6   :  { %16 = vsyncpa [#allocation5 + $0x1], 0  ;;  %s1196_s18 = smov 0   ;;  %s1198_s19 = smov 0  }
   0x7   :  { %s1200_s20 = smov 0   ;;  %s1202_s21 = smov 0  }
   0x8   :  { %s1204_s22 = smov 0   ;;  %s1206_s23 = smov 0  }
   0x9 LB: > { %s790_s24 = sadd.s32 4294967295, %s1155_s23   ;;  %s791_s25 = sadd.s32 4294967294, %s1155_s23   ;;  %s1155_s23 = sphi %s1206_s23, %s22_s23   ;;  %s1151_s22 = sphi %s1204_s22, %s1416_s22   ;;  %s1147_s21 = sphi %s1202_s21, %s1415_s21   ;;  %s1143_s20 = sphi %s1200_s20, %s1414_s20   ;;  %s1139_s19 = sphi %s1198_s19, %s1413_s19   ;;  %s1135_s18 = sphi %s1196_s18, %s1412_s18  }
   0xa   : > { %p54_p0 = scmp.ne.s32.totalorder %s1139_s19, %s1135_s18  ;;  %p1230_p1 = scmp.eq.s32.totalorder %s790_s24, 0 }
   0xb   : > { %p1234_p2 = scmp.eq.s32.totalorder %s790_s24, 1  ;;  %p183_p3 = scmp.eq.s32.totalorder %s791_s25, 1 }
   0xc   : > { %s1399_s26 = scalar_select %p1230_p1, 1, 0 }
   0xd   : > { %p1240_p4 = por %p1230_p1, %p54_p0  ;;  %p792_p5 = scmp.ge.s32.totalorder %s1155_s23, 1 }
   0xe   : > { %p1245_p6 = por %p183_p3, %p54_p0  ;;  %p190_p7 = scmp.lt.s32.totalorder %s1155_s23, 3 }
   0xf   : > { %s1401_s28 = scalar_select %p1240_p4, 1, 0 }
  0x10   : > { %s1402_s29 = scalar_select %p1245_p6, 1, 0 }
  0x11   : > { %p1250_p8 = pnand %p792_p5, %p190_p7  ;;  %s1157_s6 = smov [#allocation6]  }
  0x12   : > { %s205_s7 = sshll.u32 %s1157_s6, 4  ;;  %s1158_s9 = smov [#allocation8]   ;;  %s206_s7 = int_to_ptr.vmem [resolvable:$true] %s205_s7 }
  0x13   : > { %p875_p9 = pneg %p1250_p8  ;;  %s229_s10 = sshll.u32 %s1158_s9, 4  ;;  %s230_s10 = int_to_ptr.vmem [resolvable:$true] %s229_s10 }
  0x14   : > { %s1002_s11 = scalar_lea.vmem %s206_s7, 2048  ;;  %p1010_p5 = scmp.lt.s32.totalorder %s206_s7, %s206_s7 }
  0x15   : > { %p1259_p11 = pnand %p875_p9, %p1230_p1  ;;  %p1003_p13 = scmp.ne.s32.totalorder %s206_s7, %s1002_s11 }
  0x16   : > { %p1011_p7 = scmp.lt.s32.totalorder %s1002_s11, %s1002_s11 }
  0x17   : > { %p993_p12 = pneg %p1259_p11 }
  0x18   : > { %p1012_p10 = por %p1011_p7, %p1010_p5 }
  0x19   : > { %p1005_p0 = pnand %p1003_p13, %p993_p12 }
  0x1b   : > { %p1006_p3 = pneg %p1005_p0 }
  0x1d   : > { %p1013_p9 = pnand %p1012_p10, %p1006_p3 }
  0x1f   : > { %1016 = shalt.err (!%p1013_p9)
}
  0x20   : > { %s1159_s12 = smov 128   ;;  %s1160_s13 = smov 8  }
  0x21   : > { %s1405_s1 = sld [smem:[#allocation13_spill]]  ;;  %s1028_s16 = scalar_lea.vmem %s230_s10, 2048 }
  0x22   : > { %p1029_p6 = scmp.ne.s32.totalorder %s230_s10, %s1028_s16  ;;  %p1036_p1 = scmp.lt.s32.totalorder %s230_s10, %s230_s10 }
  0x23   : > { %p1037_p4 = scmp.lt.s32.totalorder %s1028_s16, %s1028_s16 }
  0x24   : > { %p1031_p13 = pnand %p1029_p6, %p993_p12 }
  0x25   : > { %p1038_p5 = por %p1037_p4, %p1036_p1 }
  0x26   : > { %p1032_p0 = pneg %p1031_p13 }
  0x27   : > { %878 = dma.hbm_to_vmem [thread:$0]  (!%p1259_p11), %s1405_s1, 2048, %s206_s7, [#allocation7], %s1159_s12, %s1159_s12, %s1160_s13  }
  0x28   : > { %p1039_p10 = pnand %p1038_p5, %p1032_p0 }
  0x2a   : > { %1042 = shalt.err (!%p1039_p10)
}
  0x2b   : > { %s1161_s17 = smov 64   ;;  %s1162_s24 = smov 4  }
  0x2c   : > { %881 = dma.hbm_to_vmem [thread:$0]  (!%p1259_p11), %s1392_s3, 2048, %s230_s10, [#allocation7], %s1161_s17, %s1161_s17, %s1162_s24  }
  0x2d   : > { %s34_s7 = sadd.s32 1, %s1151_s22  ;;  %s41_s9 = sadd.s32 1, %s1143_s20 }
  0x2e   : > { %p36_p1 = scmp.ge.s32.totalorder %s34_s7, 2  ;;  %p48_p4 = scmp.ne.s32.totalorder %s1143_s20, %s1139_s19 }
  0x2f   : > { %p49_p6 = scmp.eq.s32.totalorder %s1155_s23, 0  ;;  %p892_p12 = scmp.lt.s32.totalorder %s1155_s23, 2 }
  0x30   : > { %s1418_s7 = smov (%p36_p1, %s34_s7), 0  ;;  %p1291_p7 = por %p1234_p2, %p48_p4 }
  0x31   : > { %p50_p3 = por %p49_p6, %p48_p4  ;;  %s38_s8 = ssub.s32 %s1151_s22, %s1418_s7 }
  0x32   : > { %s246_s12 = sand.u32 1, %s1143_s20   ;;  %p39_p9 = scmp.eq.s32.totalorder %s38_s8, 0 }
  0x33   : > { %s797_s10 = sshll.u32 %s246_s12, 3  ;;  %s798_s13 = sshll.u32 %s1151_s22, 7 }
  0x34   : > { %s1300_s14 = scalar_select %p39_p9, %s1143_s20, %s41_s9  }
  0x35   : > { %s255_s17 = scalar_lea.hbm %s1389_s0, %s798_s13  ;;  %s250_s24 = scalar_lea.vmem [#allocation3], %s797_s10 }
  0x36   : > { %s257_s25 = sshll.u32 %s250_s24, 4  ;;  %p1307_p11 = pnand %p892_p12, %p50_p3  ;;  %s258_s25 = int_to_ptr.vmem [resolvable:$true] %s257_s25 }
  0x37   : > { %s247_s6 = scalar_lea.sflag [#allocation4], %s246_s12  ;;  %s1056_s8 = scalar_lea.vmem %s258_s25, 128 }
  0x38   : > { %p1045_p2 = pneg %p1307_p11  ;;  %p1057_p13 = scmp.ne.s32.totalorder %s258_s25, %s1056_s8 }
  0x39   : > { %s1163_s9 = smov [#allocation3]  }
  0x3a   : > { %p1059_p0 = pnand %p1057_p13, %p1045_p2  ;;  %s1061_s1 = sshll.u32 %s1163_s9, 4  ;;  %s1062_s1 = int_to_ptr.vmem [resolvable:$false] %s1061_s1 }
  0x3b   : > { %s1063_s13 = scalar_lea.vmem %s1062_s1, 256  ;;  %p1064_p10 = scmp.lt.s32.totalorder %s258_s25, %s1062_s1 }
  0x3c   : > { %p1060_p5 = pneg %p1059_p0  ;;  %p1065_p1 = scmp.lt.s32.totalorder %s1063_s13, %s1056_s8 }
  0x3e   : > { %p1066_p4 = por %p1065_p1, %p1064_p10 }
  0x40   : > { %p1067_p6 = pnand %p1066_p4, %p1060_p5 }
  0x42   : > { %1070 = shalt.err (!%p1067_p6)
}
  0x43   : > { %885 = dma.hbm_to_vmem [thread:$0]  (!%p1307_p11), %s255_s17, 128, %s258_s25, %s247_s6  }
  0x44   : > { %266 = sbr.rel (%p1250_p8) target bundleno = 524 (0x20c), region = 40  ;;  %s1318_s12 = sand.u32 (!%p1250_p8), 1, %s1139_s19  }
  0x45   : > { %s800_s10 = sshll.u32 (!%p1250_p8), %s1318_s12, 3  ;;  %s269_s15 = scalar_lea.sflag (!%p1250_p8), [#allocation4], %s1318_s12 }
  0x46   : > { %s1324_s1 = scalar_lea.vmem (!%p1250_p8), [#allocation3], %s800_s10  ;;  %p1408_p12 = scmp.ne.s32.totalorder (!%p1250_p8), %s1401_s28, 0 }
  0x49   : > { %1122 = dma.done.wait (%p1408_p12), %s269_s15, 128  }
  0x4a   : > { %1124 = vsyncadd (%p1408_p12), %s269_s15, 4294967168  ;;  %p1409_p3 = scmp.ne.s32.totalorder %s1399_s26, 0 }
  0x4c   : > { %1126 = dma.done.wait (%p1409_p3), [#allocation7], 4096  }
  0x4d   : > { %1128 = vsyncadd (%p1409_p3), [#allocation7], 4294963200  ;;  %v1164_v0 = vmov 0   ;;  %v951_v1 = vld [vmem:[#allocation6 + $0x74] ss:$8 sps:$4 sm:$0xff]   ;;  %v979_v15 = vld [vmem:[#allocation8 + $0x68] sm:$0xff]   ;;  %v344_v35 = vlaneseq }
  0x4e   : > { %466 = vmatprep.mubr.bf16.mxu0 %v1164_v0  ;;  %v953_v2 = vld [vmem:[#allocation6 + $0x70] ss:$8 sps:$4 sm:$0xff]   ;;  %434 = vmatprep.subr.bf16.mxu0 %v951_v1  ;;  %v954_v3 = vld [vmem:[#allocation6 + $0x64] ss:$8 sps:$4 sm:$0xff]   ;;  %v956_v4 = vld [vmem:[#allocation6 + $0x60] ss:$8 sps:$4 sm:$0xff]  }
  0x4f   : > { %435 = vmatpush1.bf16.msra.mxu0 %v953_v2  ;;  %v957_v5 = vld [vmem:[#allocation6 + $0x54] ss:$8 sps:$4 sm:$0xff]   ;;  %v959_v6 = vld [vmem:[#allocation6 + $0x50] ss:$8 sps:$4 sm:$0xff]   ;;  %v960_v7 = vld [vmem:[#allocation6 + $0x44] ss:$8 sps:$4 sm:$0xff]  }
  0x50   : > { %436 = vmatprep.subr.bf16.mxu0 %v954_v3  ;;  %v962_v8 = vld [vmem:[#allocation6 + $0x40] ss:$8 sps:$4 sm:$0xff]   ;;  %v963_v9 = vld [vmem:[#allocation6 + $0x34] ss:$8 sps:$4 sm:$0xff]   ;;  %v965_v12 = vld [vmem:[#allocation6 + $0x30] ss:$8 sps:$4 sm:$0xff]  }
  0x51   : > { %v975_v10 = vld [vmem:[#allocation8 + $0x78] sm:$0xff]   ;;  %v977_v13 = vld [vmem:[#allocation8 + $0x70] sm:$0xff]   ;;  %v966_v16 = vld [vmem:[#allocation6 + $0x24] ss:$8 sps:$4 sm:$0xff]   ;;  %v345_v36 = vshrl.u32 %v344_v35, 7  ;;  %s838_s17 = sshll.u32 %s1147_s21, 7 }
  0x52   : > { %v976_v11 = vld [vmem:[#allocation8 + $0x38] sm:$0xff]   ;;  %841 = vmatprep.subr.bf16.mxu1 %v975_v10  ;;  %v978_v14 = vld [vmem:[#allocation8 + $0x30] sm:$0xff]   ;;  %v968_v17 = vld [vmem:[#allocation6 + $0x20] ss:$8 sps:$4 sm:$0xff]   ;;  %s310_s24 = scalar_lea.vmem [#allocation9], %s800_s10  ;;  %s1347_s8 = scalar_lea.hbm %s1394_s5, %s838_s17 }
  0x53   : > { %437 = vmatpush1.bf16.msra.mxu0 %v956_v4  ;;  %842 = vmatpush3.bf16.msra.mxu1 %v976_v11  ;;  %v980_v18 = vld [vmem:[#allocation8 + $0x28] sm:$0xff]   ;;  %v981_v19 = vld [vmem:[#allocation8 + $0x60] sm:$0xff]   ;;  %v969_v20 = vld [vmem:[#allocation6 + $0x14] ss:$8 sps:$4 sm:$0xff]   ;;  %v346_v37 = vsub.s32 0, %v345_v36  ;;  %v350_v39 = vsub.s32 1, %v345_v36 }
  0x54   : > { %438 = vmatprep.subr.bf16.mxu0 %v957_v5  ;;  %843 = vmatprep.subr.bf16.mxu1 %v977_v13  ;;  %v971_v21 = vld [vmem:[#allocation6 + $0x10] ss:$8 sps:$4 sm:$0xff]   ;;  %v972_v22 = vld [vmem:[#allocation6 + $0x4] ss:$8 sps:$4 sm:$0xff]   ;;  %v974_v26 = vld [vmem:[#allocation6] ss:$8 sps:$4 sm:$0xff]  }
  0x55   : > { %v982_v23 = vld [vmem:[#allocation8 + $0x20] sm:$0xff]   ;;  %v983_v24 = vld [vmem:[#allocation8 + $0x58] sm:$0xff]   ;;  %v985_v28 = vld [vmem:[#allocation8 + $0x50] sm:$0xff]   ;;  %s677_s25 = sshll.u32 %s310_s24, 4  ;;  %s664_s9 = scalar_lea.sflag [#allocation5], %s1318_s12  ;;  %s678_s25 = int_to_ptr.vmem [resolvable:$true] %s677_s25 }
  0x56   : > { %v984_v25 = vld [vmem:[#allocation8 + $0x18] sm:$0xff]   ;;  %v986_v30 = vld [vmem:[#allocation8 + $0x10] sm:$0xff]   ;;  %v987_v31 = vld [vmem:[#allocation8 + $0x48] sm:$0xff]   ;;  %s1071_s13 = scalar_lea.vmem %s678_s25, 128  ;;  %s1165_s21 = smov [#allocation9]  }
  0x57   : > { %439 = vmatpush1.bf16.msra.mxu0 %v959_v6  ;;  %844 = vmatpush3.bf16.msra.mxu1 %v978_v14  ;;  %v324_v27 = vld [vmem:[%s1324_s1] sm:$0xff]  ;;  %v988_v32 = vld [vmem:[#allocation8 + $0x8] sm:$0xff]   ;;  %v989_v33 = vld [vmem:[#allocation8 + $0x40] sm:$0xff]   ;;  %p1072_p8 = scmp.ne.s32.totalorder %s678_s25, %s1071_s13  ;;  %s1075_s10 = sshll.u32 %s1165_s21, 4  ;;  %s1076_s10 = int_to_ptr.vmem [resolvable:$false] %s1075_s10 }
  0x58   : > { %440 = vmatprep.subr.bf16.mxu0 %v960_v7  ;;  %845 = vmatprep.subr.bf16.mxu1 %v979_v15  ;;  %v325_v29 = vpack.c.bf16 %v324_v27, %v324_v27  ;;  %v990_v34 = vld [vmem:[#allocation8] sm:$0xff]   ;;  %v342_v38 = vld [vmem:[%s1391_s2] sm:$0x3]  ;;  %s1077_s15 = scalar_lea.vmem %s1076_s10, 256  ;;  %p1078_p2 = scmp.lt.s32.totalorder %s678_s25, %s1076_s10 }
  0x59   : > { %v347_v40 = vrot.slane %v342_v38, %v346_v37  ;;  %v351_v41 = vrot.slane %v342_v38, %v350_v39  ;;  %v836_v54 = vld [vmem:[%s1393_s4] ss:$0 sm:$0xff]  ;;  %p1073_p9 = pnand %p1072_p8, %p1291_p7  ;;  %p1079_p13 = scmp.lt.s32.totalorder %s1077_s15, %s1071_s13 }
  0x5b   : > { %441 = vmatpush1.bf16.msra.mxu0 %v962_v8  ;;  %846 = vmatpush3.bf16.msra.mxu1 %v980_v18  ;;  %p1074_p11 = pneg %p1073_p9  ;;  %p1080_p0 = por %p1079_p13, %p1078_p2 }
  0x5c   : > { %442 = vmatprep.subr.bf16.mxu0 %v963_v9  ;;  %847 = vmatprep.subr.bf16.mxu1 %v981_v19 }
  0x5d   : > { %p1081_p5 = pnand %p1080_p0, %p1074_p11 }
  0x5f   : > { %443 = vmatpush1.bf16.msra.mxu0 %v965_v12  ;;  %848 = vmatpush3.bf16.msra.mxu1 %v982_v23 }
  0x60   : > { %444 = vmatprep.subr.bf16.mxu0 %v966_v16  ;;  %849 = vmatprep.subr.bf16.mxu1 %v983_v24 }
  0x63   : > { %445 = vmatpush1.bf16.msra.mxu0 %v968_v17  ;;  %850 = vmatpush3.bf16.msra.mxu1 %v984_v25 }
  0x64   : > { %446 = vmatprep.subr.bf16.mxu0 %v969_v20  ;;  %851 = vmatprep.subr.bf16.mxu1 %v985_v28 }
  0x67   : > { %447 = vmatpush1.bf16.msra.mxu0 %v971_v21  ;;  %852 = vmatpush3.bf16.msra.mxu1 %v986_v30 }
  0x68   : > { %448 = vmatprep.subr.bf16.mxu0 %v972_v22  ;;  %853 = vmatprep.subr.bf16.mxu1 %v987_v31 }
  0x6b   : > { %449 = vmatpush1.bf16.msra.mxu0 %v974_v26  ;;  %854 = vmatpush3.bf16.msra.mxu1 %v988_v32 }
  0x6c   : > { %855 = vmatprep.subr.bf16.mxu1 %v989_v33 }
  0x6e   : > { %467 = vmatmul.mubr.bf16.vlgmr.msra.gmra.mxu0 %v325_v29 }
  0x6f   : > { %856 = vmatpush3.bf16.msra.mxu1 %v990_v34 }
 0x12e   : > { %v468_v42 = vpop.f32.mrf.mxu0 }
 0x12f   : > { %v469_v43 = vadd.f32 %v468_v42, %v347_v40 }
 0x130   : > { %v470_v44 = vpop.f32.mrf.mxu0 }
 0x131   : > { %v471_v45 = vadd.f32 %v470_v44, %v351_v41  ;;  %v475_v46 = vmax.f32 %v469_v43, 0.0 }
 0x132   : > { %v472_v47 = vpop.f32.mrf.mxu0 }
 0x133   : > { %v476_v48 = vmax.f32 %v471_v45, 0.0  ;;  %v478_v51 = vpack.c.bf16 %v475_v46, %v475_v46 }
 0x134   : > { %v473_v49 = vpop.f32.mrf.mxu0 }
 0x135   : > { %v479_v50 = vpack.c.bf16 %v476_v48, %v476_v48 }
 0x137   : > { %640 = vmatprep.mubr.bf16.mxu1 %v479_v50 }
 0x138   : > { %641 = vmatmul.mubr.bf16.vlgmr.msra.gmra.mxu1 %v478_v51 }
 0x1f8   : > { %v857_v52 = vpop.f32.mrf.mxu1 }
 0x1fa   : > { %v858_v53 = vpop.f32.mrf.mxu1 }
 0x1fb   : > { %v859_v55 = vadd.f32 %v858_v53, %v857_v52 }
 0x1fc   : > { %v860_v56 = vpop.f32.mrf.mxu1 }
 0x1fd   : > { %v661_v57 = vadd.f32 %v859_v55, %v836_v54 }
 0x1fe   : > { %v861_v58 = vpop.f32.mrf.mxu1 }
 0x1ff   : > { %662 = vst [vmem:[%s310_s24] sm:$0xff] %v661_v57 }
 0x200   : > { %1084 = shalt.err (!%p1081_p5)
}
 0x201   : > { %s1085_s1 = scalar_lea.hbm %s1347_s8, 128  ;;  %s1089_s28 = scalar_lea.hbm %s1394_s5, 256 }
 0x202   : > { %p1086_p10 = scmp.ne.s32.totalorder %s1347_s8, %s1085_s1  ;;  %p1090_p6 = scmp.lt.s32.totalorder %s1347_s8, %s1394_s5 }
 0x203   : > { %p1091_p12 = scmp.lt.s32.totalorder %s1089_s28, %s1085_s1 }
 0x204   : > { %p1087_p1 = pnand %p1086_p10, %p1291_p7 }
 0x205   : > { %p1092_p3 = por %p1091_p12, %p1090_p6 }
 0x206   : > { %p1088_p4 = pneg %p1087_p1 }
 0x208   : > { %p1093_p8 = pnand %p1092_p3, %p1088_p4 }
 0x20a   : > { %1096 = shalt.err (!%p1093_p8)
}
 0x20b   : > { %873 = dma.vmem_to_hbm [thread:$0]  (%p1291_p7), %s678_s25, 128, %s1347_s8, %s664_s9  }
 0x20c PF: > { %s689_s17 = sand.u32 1, %s1135_s18   ;;  %p1410_p9 = scmp.ne.s32.totalorder %s1402_s29, 0 }
 0x20d   : > { %p1411_p11 = scmp.ge.s32.totalorder %s1155_s23, 2  ;;  %s690_s24 = scalar_lea.sflag [#allocation5], %s689_s17 }
 0x20f   : > { %p887_p2 = pnand %p1411_p11, %p1410_p9 }
 0x211   : > { %p888_p13 = pneg %p887_p2 }
 0x213   : > { %1130 = dma.done.wait (%p888_p13), %s690_s24, 128  }
 0x214   : > { %1132 = vsyncadd (%p888_p13), %s690_s24, 4294967168  ;;  %s22_s23 = sadd.s32 1, %s1155_s23   ;;  %s1412_s18 = smov %s1139_s19 }
 0x215   : > { %p19_p0 = scmp.ge.s32.totalorder %s22_s23, 4   ;;  %s1413_s19 = smov %s1143_s20 }
 0x216   : > { %s1414_s20 = smov %s1300_s14  ;;  %s1415_s21 = smov %s1151_s22 }
 0x217   : > { %s1416_s22 = smov %s1418_s7  ;;  %21 = sbr.rel (!%p19_p0) target bundleno = 9 (0x9), region = 106 }
 0x21c   :  { %695 = vsyncpa [#allocation4], 1 }
 0x21d   :  { %697 = vsyncpa [#allocation4 + $0x1], 1 }
 0x21e   :  { %698 = vsyncpa [#allocation7], 1 }
 0x21f   :  { %699 = vsyncpa [#allocation5], 1 }
 0x220   :  { %701 = vsyncpa [#allocation5 + $0x1], 1 }

</bundles_post_ra>
